<compile_context>
chip_gen: v7x
topology: tpu7x:2x2x1
jax: 0.10.0
libtpu: 0.0.40
codegen_flags: <defaults>
</compile_context>

<pallas_src>
import jax
import jax.numpy as jnp
from jax.experimental import pallas as pl
from jax.experimental.pallas import tpu as pltpu


def _round_up(x, m):
    return (x + m - 1) // m * m


def dqn_actor_kernel(state_ref, w0_ref, w1_ref, wv_ref, bias_ref, v_ref):
    """Fused 3-layer MLP on one batch tile: relu(x@W0+b0) -> relu(.@W1+b1) -> .@Wv+bv."""
    h0p = w0_ref.shape[1]          # padded H0 (multiple of 128)
    h1p = w1_ref.shape[1]          # padded H1
    a = v_ref.shape[1]             # real (unpadded) action_size

    biases = bias_ref[...]                                    # (3, DMAX) f32
    x = state_ref[...].astype(jnp.bfloat16)                   # (TB, S) -> bf16 for MXU
    # (astype is a no-op if the caller already supplies bf16 state.)

    h = jnp.dot(x, w0_ref[...], preferred_element_type=jnp.float32)
    h = jnp.maximum(h + biases[0:1, :h0p], 0.0)               # f32 bias + relu

    h = jnp.dot(h.astype(jnp.bfloat16), w1_ref[...],
                preferred_element_type=jnp.float32)
    h = jnp.maximum(h + biases[1:2, :h1p], 0.0)

    # Value head in f32 (h is already f32; Wv kept f32 for accuracy).
    v = jnp.dot(h, wv_ref[...], preferred_element_type=jnp.float32)  # (TB, 128)
    v_ref[...] = (v[:, :a] + biases[2:3, :a]).astype(v_ref.dtype)    # compact store


def dqn_actor_forward(state, packed_params, *, action_size, block_b=1024):
    """Batch-gridded pallas_call. Weights/biases resident in VMEM across grid steps."""
    w0p, w1p, wvp, biases = packed_params
    b, s = state.shape

    # Batch tile: multiple of 8 sublanes, up to block_b rows per grid step.
    b_rounded = _round_up(max(b, 1), 8)
    tb = max(8, (min(block_b, b_rounded) // 8) * 8)
    # v7x megacore: if the whole batch fits in one tile, split it in two so the
    # "parallel" grid axis can shard across both TensorCores.
    if pl.cdiv(b, tb) < 2 and b_rounded >= 16:
        tb = _round_up(pl.cdiv(b_rounded, 2), 8)
    grid = (pl.cdiv(b, tb),)   # ragged last block: Pallas clamps reads/writes

    out = pl.pallas_call(
        dqn_actor_kernel,
        out_shape=jax.ShapeDtypeStruct((b, action_size), jnp.float32),
        grid_spec=pltpu.PrefetchScalarGridSpec(
            num_scalar_prefetch=0,
            grid=grid,
            in_specs=[
                pl.BlockSpec((tb, s), lambda i: (i, 0)),        # state tile (pipelined)
                pl.BlockSpec(w0p.shape, lambda i: (0, 0)),      # weights: VMEM-resident
                pl.BlockSpec(w1p.shape, lambda i: (0, 0)),
                pl.BlockSpec(wvp.shape, lambda i: (0, 0)),
                pl.BlockSpec(biases.shape, lambda i: (0, 0)),   # packed biases
            ],
            out_specs=pl.BlockSpec((tb, action_size), lambda i: (i, 0)),
        ),
        compiler_params=pltpu.CompilerParams(
            dimension_semantics=("parallel",)),
    )(state, w0p, w1p, wvp, biases)

    return out


def init_params(key, state_size, hidden_layers, action_size,
                output_layer_init_std=0.01):
    """Deterministic init matching PyTorch __init__ (kaiming_normal / zeros /
    normal(std=output_layer_init_std)). Weights stored as (in, out), f32."""
    h0, h1 = hidden_layers
    k0, k1, kv = jax.random.split(key, 3)

    def kaiming(k, fan_in, fan_out):
        # kaiming_normal_ with nonlinearity='relu': std = sqrt(2 / fan_in)
        std = (2.0 / fan_in) ** 0.5
        return std * jax.random.normal(k, (fan_in, fan_out), jnp.float32)

    w0 = kaiming(k0, state_size, h0)
    b0 = jnp.zeros((h0,), jnp.float32)
    w1 = kaiming(k1, h0, h1)
    b1 = jnp.zeros((h1,), jnp.float32)
    wv = output_layer_init_std * jax.random.normal(
        kv, (h1, action_size), jnp.float32)
    bv = jnp.zeros((action_size,), jnp.float32)
    # NOTE: self.layers[-1] (the Linear(h1 -> action_size) "Q head") is
    # initialized in the PyTorch module but never used by forward() when
    # len(hidden_layers) >= 2, so it is not materialized here.
    return (w0, b0, w1, b1, wv, bv)


def prepare_params(raw_params):
    """Zero-pad every feature dim to a multiple of 128 lanes (exact through
    relu/matmul), cast hidden weights to bf16 (value head stays f32), and
    coalesce biases into one buffer."""
    w0, b0, w1, b1, wv, bv = raw_params
    s, h0 = w0.shape
    h1 = w1.shape[1]
    a = wv.shape[1]
    h0p, h1p, ap = _round_up(h0, 128), _round_up(h1, 128), _round_up(a, 128)
    dmax = max(h0p, h1p, ap)

    w0p = jnp.zeros((s, h0p), jnp.bfloat16).at[:, :h0].set(w0.astype(jnp.bfloat16))
    w1p = jnp.zeros((h0p, h1p), jnp.bfloat16).at[:h0, :h1].set(w1.astype(jnp.bfloat16))
    wvp = jnp.zeros((h1p, ap), jnp.float32).at[:h1, :a].set(wv)   # f32 value head
    biases = (jnp.zeros((3, dmax), jnp.float32)
              .at[0, :h0].set(b0)
              .at[1, :h1].set(b1)
              .at[2, :a].set(bv))
    return (w0p, w1p, wvp, biases)


def reference_forward(state, raw_params):
    """Plain-JAX reference using the same precision path as the kernel
    (bf16 hidden layers / f32 accumulation / f32 value head)."""
    w0, b0, w1, b1, wv, bv = raw_params
    bf = jnp.bfloat16
    h = jnp.dot(state.astype(bf), w0.astype(bf),
                preferred_element_type=jnp.float32) + b0
    h = jnp.maximum(h, 0.0)
    h = jnp.dot(h.astype(bf), w1.astype(bf),
                preferred_element_type=jnp.float32) + b1
    h = jnp.maximum(h, 0.0)
    return jnp.dot(h, wv, preferred_element_type=jnp.float32) + bv


if __name__ == "__main__":
    # Small shapes consistent with the module's MLP forward.
    batch = 2
    state_size = 16
    hidden_layers = (32, 32)   # any hidden width <=128 costs the same on TPU
    action_size = 8
    power_level = 4            # unused in forward (kept for signature parity)

    key = jax.random.PRNGKey(0)
    k_params, k_state, k_state_big = jax.random.split(key, 3)
    raw_params = init_params(k_params, state_size, hidden_layers, action_size,
                             output_layer_init_std=0.01)
    packed_params = prepare_params(raw_params)

    state = jax.random.normal(k_state, (batch, state_size), jnp.float32)

    fwd = jax.jit(dqn_actor_forward, static_argnames=("action_size", "block_b"))
    v = fwd(state, packed_params, action_size=action_size)
    v = jax.block_until_ready(v)
    assert v.shape == (batch, action_size)

    v_ref = reference_forward(state, raw_params)
    assert jnp.allclose(v, v_ref, atol=1e-3, rtol=1e-3), float(
        jnp.max(jnp.abs(v - v_ref)))

    # Extra coverage: a larger batch that exercises the ragged last block and a
    # multi-step grid (600 rows -> 2 grid steps of 304 rows, last one partial).
    big_batch = 600
    state_big = jax.random.normal(k_state_big, (big_batch, state_size),
                                  jnp.float32)
    v_big = jax.block_until_ready(
        fwd(state_big, packed_params, action_size=action_size))
    assert v_big.shape == (big_batch, action_size)
    v_big_ref = reference_forward(state_big, raw_params)
    assert jnp.allclose(v_big, v_big_ref, atol=1e-3, rtol=1e-3), float(
        jnp.max(jnp.abs(v_big - v_big_ref)))

    print("KERNEL_OK")
</pallas_src>

<mosaic_0001>
module attributes {stable_mosaic.version = 11 : i64} {
  func.func @dqn_actor_kernel(%arg0: i32, %arg1: memref<8x16xf32, #tpu.memory_space<vmem>>, %arg2: memref<16x128xbf16, #tpu.memory_space<vmem>>, %arg3: memref<128x128xbf16, #tpu.memory_space<vmem>>, %arg4: memref<128x128xf32, #tpu.memory_space<vmem>>, %arg5: memref<3x128xf32, #tpu.memory_space<vmem>>, %arg6: memref<8x8xf32, #tpu.memory_space<vmem>>) attributes {dimension_semantics = [#tpu.dimension_semantics<parallel>], iteration_bounds = array<i64: 1>, scalar_prefetch = 0 : i64, scratch_operands = 0 : i64, tpu.core_type = #tpu.core_type<tc>, window_params = [{transform_indices = @transform_0, window_bounds = array<i64: 8, 16>}, {pipeline_mode = #tpu.pipeline_mode<synchronous>, transform_indices = @transform_1, window_bounds = array<i64: 16, 128>}, {pipeline_mode = #tpu.pipeline_mode<synchronous>, transform_indices = @transform_2, window_bounds = array<i64: 128, 128>}, {pipeline_mode = #tpu.pipeline_mode<synchronous>, transform_indices = @transform_3, window_bounds = array<i64: 128, 128>}, {pipeline_mode = #tpu.pipeline_mode<synchronous>, transform_indices = @transform_4, window_bounds = array<i64: 3, 128>}, {transform_indices = @transform_5, window_bounds = array<i64: 8, 8>}]} {
    %c0 = arith.constant 0 : index
    %c0_0 = arith.constant 0 : index
    %0 = vector.load %arg5[%c0, %c0_0] : memref<3x128xf32, #tpu.memory_space<vmem>>, vector<3x128xf32>
    %c0_1 = arith.constant 0 : index
    %c0_2 = arith.constant 0 : index
    %1 = vector.load %arg1[%c0_1, %c0_2] : memref<8x16xf32, #tpu.memory_space<vmem>>, vector<8x16xf32>
    %2 = arith.truncf %1 : vector<8x16xf32> to vector<8x16xbf16>
    %c0_3 = arith.constant 0 : index
    %c0_4 = arith.constant 0 : index
    %3 = vector.load %arg2[%c0_3, %c0_4] : memref<16x128xbf16, #tpu.memory_space<vmem>>, vector<16x128xbf16>
    %cst = arith.constant dense<0.000000e+00> : vector<8x128xf32>
    %4 = tpu.matmul %2, %3, %cst {dimension_numbers = #tpu.dot_dimension_numbers<[1], [0], [0], [1], [0, 0, 1, 1], [], []>} : vector<8x16xbf16>, vector<16x128xbf16>, vector<8x128xf32> -> vector<8x128xf32>
    %5 = vector.extract_strided_slice %0 {offsets = [0, 0], sizes = [1, 128], strides = [1, 1]} : vector<3x128xf32> to vector<1x128xf32>
    %6 = vector.broadcast %5 : vector<1x128xf32> to vector<8x128xf32>
    %7 = arith.addf %4, %6 : vector<8x128xf32>
    %cst_5 = arith.constant 0.000000e+00 : f32
    %8 = vector.broadcast %cst_5 : f32 to vector<8x128xf32>
    %9 = arith.maximumf %7, %8 : vector<8x128xf32>
    %10 = arith.truncf %9 : vector<8x128xf32> to vector<8x128xbf16>
    %c0_6 = arith.constant 0 : index
    %c0_7 = arith.constant 0 : index
    %11 = vector.load %arg3[%c0_6, %c0_7] : memref<128x128xbf16, #tpu.memory_space<vmem>>, vector<128x128xbf16>
    %cst_8 = arith.constant dense<0.000000e+00> : vector<8x128xf32>
    %12 = tpu.matmul %10, %11, %cst_8 {dimension_numbers = #tpu.dot_dimension_numbers<[1], [0], [0], [1], [0, 0, 1, 1], [], []>} : vector<8x128xbf16>, vector<128x128xbf16>, vector<8x128xf32> -> vector<8x128xf32>
    %13 = vector.extract_strided_slice %0 {offsets = [1, 0], sizes = [1, 128], strides = [1, 1]} : vector<3x128xf32> to vector<1x128xf32>
    %14 = vector.broadcast %13 : vector<1x128xf32> to vector<8x128xf32>
    %15 = arith.addf %12, %14 : vector<8x128xf32>
    %cst_9 = arith.constant 0.000000e+00 : f32
    %16 = vector.broadcast %cst_9 : f32 to vector<8x128xf32>
    %17 = arith.maximumf %15, %16 : vector<8x128xf32>
    %c0_10 = arith.constant 0 : index
    %c0_11 = arith.constant 0 : index
    %18 = vector.load %arg4[%c0_10, %c0_11] : memref<128x128xf32, #tpu.memory_space<vmem>>, vector<128x128xf32>
    %cst_12 = arith.constant dense<0.000000e+00> : vector<8x128xf32>
    %19 = tpu.matmul %17, %18, %cst_12 {dimension_numbers = #tpu.dot_dimension_numbers<[1], [0], [0], [1], [0, 0, 1, 1], [], []>} : vector<8x128xf32>, vector<128x128xf32>, vector<8x128xf32> -> vector<8x128xf32>
    %20 = vector.extract_strided_slice %19 {offsets = [0, 0], sizes = [8, 8], strides = [1, 1]} : vector<8x128xf32> to vector<8x8xf32>
    %21 = vector.extract_strided_slice %0 {offsets = [2, 0], sizes = [1, 8], strides = [1, 1]} : vector<3x128xf32> to vector<1x8xf32>
    %22 = vector.broadcast %21 : vector<1x8xf32> to vector<8x8xf32>
    %23 = arith.addf %20, %22 : vector<8x8xf32>
    %c0_13 = arith.constant 0 : index
    %c0_14 = arith.constant 0 : index
    %24 = vector.load %arg6[%c0_13, %c0_14] : memref<8x8xf32, #tpu.memory_space<vmem>>, vector<8x8xf32>
    tpu.vector_store %arg6[%c0_13, %c0_14], %23 {strides = array<i32>} : memref<8x8xf32, #tpu.memory_space<vmem>>, vector<8x8xf32>,
    return
  }
  func.func @transform_0(%arg0: i32) -> (i32, i32) {
    %c0_i32 = arith.constant 0 : i32
    %c0_i32_0 = arith.constant 0 : i32
    return %arg0, %c0_i32 : i32, i32
  }
  func.func @transform_1(%arg0: i32) -> (i32, i32) {
    %c0_i32 = arith.constant 0 : i32
    %c0_i32_0 = arith.constant 0 : i32
    %c0_i32_1 = arith.constant 0 : i32
    return %c0_i32, %c0_i32_0 : i32, i32
  }
  func.func @transform_2(%arg0: i32) -> (i32, i32) {
    %c0_i32 = arith.constant 0 : i32
    %c0_i32_0 = arith.constant 0 : i32
    %c0_i32_1 = arith.constant 0 : i32
    return %c0_i32, %c0_i32_0 : i32, i32
  }
  func.func @transform_3(%arg0: i32) -> (i32, i32) {
    %c0_i32 = arith.constant 0 : i32
    %c0_i32_0 = arith.constant 0 : i32
    %c0_i32_1 = arith.constant 0 : i32
    return %c0_i32, %c0_i32_0 : i32, i32
  }
  func.func @transform_4(%arg0: i32) -> (i32, i32) {
    %c0_i32 = arith.constant 0 : i32
    %c0_i32_0 = arith.constant 0 : i32
    %c0_i32_1 = arith.constant 0 : i32
    return %c0_i32, %c0_i32_0 : i32, i32
  }
  func.func @transform_5(%arg0: i32) -> (i32, i32) {
    %c0_i32 = arith.constant 0 : i32
    %c0_i32_0 = arith.constant 0 : i32
    return %arg0, %c0_i32 : i32, i32
  }
}

</mosaic_0001>

<bundles_post_ra>
// kernel: dqn_actor_forward.1
= control target key start
LH: loop header
LB: loop body
LE: loop exit
PB: predicated region body
PF: predicated region fallthrough
CT: control target
= control target key end

     0   :  { %10 = vsyncpa [#allocation3], 0  ;;  %s749_s0 = inlined_call_operand.hbm [shape: f32[2,16], index: 0, kind: input, shape index: {}]   ;;  %s750_s1 = inlined_call_operand.hbm [shape: bf16[16,128], index: 1, kind: input, shape index: {}]   ;;  %s751_s2 = inlined_call_operand.hbm [shape: bf16[128,128], index: 2, kind: input, shape index: {}]   ;;  %s752_s3 = inlined_call_operand.hbm [shape: f32[128,128], index: 3, kind: input, shape index: {}]   ;;  %s753_s4 = inlined_call_operand.vmem [shape: f32[3,128], index: 4, kind: input, shape index: {}]   ;;  %s754_s5 = inlined_call_operand.hbm [shape: f32[2,8], index: 5, kind: output, shape index: {}]  }
   0x1   :  { %11 = vsyncpa [#allocation6], 0 }
   0x2   :  { %12 = vsyncpa [#allocation9], 0 }
   0x3   :  { %13 = vsyncpa [#allocation4], 0 }
   0x4   :  { %18 = vsyncadd [#allocation3], 96  ;;  %s623_s18 = smov [#allocation5]   ;;  %s505_s22 = scalar_lea.hbm %s750_s1, 128 }
   0x5   :  { %s31_s19 = sshll.u32 %s623_s18, 4  ;;  %p506_p0 = scmp.ne.s32.totalorder %s750_s1, %s505_s22  ;;  %s32_s19 = int_to_ptr.vmem [resolvable:$true] %s31_s19 }
   0x6   :  { %p509_p1 = scmp.lt.u32.totalorder %s505_s22, %s750_s1 }
   0x8   :  { %p511_p2 = pnand %p509_p1, %p506_p0 }
   0xa   :  { %514 = shalt.err (!%p511_p2)
}
   0xb   :  { %s515_s27 = scalar_lea.vmem %s32_s19, 128  ;;  %p520_p4 = scmp.lt.s32.totalorder %s32_s19, %s32_s19 }
   0xc   :  { %p516_p3 = scmp.ne.s32.totalorder %s32_s19, %s515_s27  ;;  %p521_p5 = scmp.lt.s32.totalorder %s515_s27, %s515_s27 }
   0xe   :  { %p522_p6 = por %p521_p5, %p520_p4 }
  0x10   :  { %p523_p7 = pnand %p522_p6, %p516_p3 }
  0x12   :  { %526 = shalt.err (!%p523_p7)
}
  0x13   :  { %s624_s28 = smov 64   ;;  %s625_s29 = smov 4  }
  0x14   :  { %37 = dma.hbm_to_vmem [thread:$0]  %s750_s1, 128, %s32_s19, [#allocation6], %s624_s28, %s624_s28, %s625_s29  }
  0x15   :  { %s626_s7 = smov [#allocation2]   ;;  %s527_s11 = scalar_lea.hbm %s749_s0, 32 }
  0x16   :  { %s19_s8 = sshll.u32 %s626_s7, 4  ;;  %p528_p8 = scmp.ne.s32.totalorder %s749_s0, %s527_s11  ;;  %s20_s8 = int_to_ptr.vmem [resolvable:$true] %s19_s8 }
  0x17   :  { %p531_p9 = scmp.lt.u32.totalorder %s527_s11, %s749_s0 }
  0x19   :  { %p533_p10 = pnand %p531_p9, %p528_p8 }
  0x1b   :  { %536 = shalt.err (!%p533_p10)
}
  0x1c   :  { %s537_s16 = scalar_lea.vmem %s20_s8, 32  ;;  %s541_s1 = scalar_lea.vmem %s20_s8, 128 }
  0x1d   :  { %p538_p11 = scmp.ne.s32.totalorder %s20_s8, %s537_s16  ;;  %p542_p12 = scmp.lt.s32.totalorder %s20_s8, %s20_s8 }
  0x1e   :  { %p543_p13 = scmp.lt.s32.totalorder %s541_s1, %s537_s16 }
  0x20   :  { %p544_p0 = por %p543_p13, %p542_p12 }
  0x22   :  { %p545_p1 = pnand %p544_p0, %p538_p11 }
  0x24   :  { %548 = shalt.err (!%p545_p1)
}
  0x25   :  { %s627_s17 = smov 32   ;;  %s628_s18 = smov 2  }
  0x26   :  { %25 = dma.hbm_to_vmem [thread:$0]  %s749_s0, 32, %s20_s8, [#allocation3], %s627_s17, %s627_s17, %s628_s18  }
  0x27   :  { %s629_s21 = smov [#allocation7]   ;;  %s630_s23 = smov [#allocation8]  }
  0x28   :  { %s43_s22 = sshll.u32 %s629_s21, 4  ;;  %s55_s24 = sshll.u32 %s630_s23, 4  ;;  %s44_s22 = int_to_ptr.vmem [resolvable:$true] %s43_s22  ;;  %s697_s24 = int_to_ptr.vmem [resolvable:$true] %s55_s24 }
  0x29   :  { %s549_s27 = scalar_lea.hbm %s751_s2, 1024 }
  0x2a   :  { %p550_p2 = scmp.ne.s32.totalorder %s751_s2, %s549_s27  ;;  %p553_p3 = scmp.lt.u32.totalorder %s549_s27, %s751_s2 }
  0x2c   :  { %p555_p4 = pnand %p553_p3, %p550_p2 }
  0x2e   :  { %558 = shalt.err (!%p555_p4)
}
  0x2f   :  { %s559_s0 = scalar_lea.vmem %s44_s22, 1024  ;;  %p564_p6 = scmp.lt.s32.totalorder %s44_s22, %s44_s22 }
  0x30   :  { %p560_p5 = scmp.ne.s32.totalorder %s44_s22, %s559_s0  ;;  %p565_p7 = scmp.lt.s32.totalorder %s559_s0, %s559_s0 }
  0x32   :  { %p566_p8 = por %p565_p7, %p564_p6 }
  0x34   :  { %p567_p9 = pnand %p566_p8, %p560_p5 }
  0x36   :  { %570 = shalt.err (!%p567_p9)
}
  0x37   :  { %49 = dma.hbm_to_vmem [thread:$0]  %s751_s2, 1024, %s44_s22, [#allocation6], %s624_s28, %s624_s28, %s625_s29  }
  0x38   :  { %s571_s13 = scalar_lea.hbm %s752_s3, 2048 }
  0x39   :  { %p572_p10 = scmp.ne.s32.totalorder %s752_s3, %s571_s13  ;;  %p575_p11 = scmp.lt.u32.totalorder %s571_s13, %s752_s3 }
  0x3b   :  { %p577_p12 = pnand %p575_p11, %p572_p10 }
  0x3d   :  { %580 = shalt.err (!%p577_p12)
}
  0x3e   :  { %s581_s19 = scalar_lea.vmem %s697_s24, 2048  ;;  %p586_p0 = scmp.lt.s32.totalorder %s697_s24, %s697_s24 }
  0x3f   :  { %p582_p13 = scmp.ne.s32.totalorder %s697_s24, %s581_s19  ;;  %p587_p1 = scmp.lt.s32.totalorder %s581_s19, %s581_s19 }
  0x41   :  { %p588_p2 = por %p587_p1, %p586_p0 }
  0x43   :  { %p589_p3 = pnand %p588_p2, %p582_p13 }
  0x45   :  { %592 = shalt.err (!%p589_p3)
}
  0x46   :  { %s631_s2 = smov 128   ;;  %s632_s28 = smov 8  }
  0x47   :  { %61 = dma.hbm_to_vmem [thread:$0]  %s752_s3, 2048, %s697_s24, [#allocation9], %s631_s2, %s631_s2, %s632_s28  }
  0x48   :  { %615 = dma.done.wait [#allocation3], 128  }
  0x49   :  { %616 = vsyncadd [#allocation3], 4294967168 }
  0x4a   :  { %617 = dma.done.wait [#allocation6], 1152  }
  0x4b   :  { %618 = vsyncadd [#allocation6], 4294966144 }
  0x4c   :  { %619 = dma.done.wait [#allocation9], 2048  }
  0x4d   :  { %620 = vsyncadd [#allocation9], 4294965248  ;;  %v633_v0 = vmov 0.0   ;;  %vm634_vm0 = vmmov 0   ;;  %v496_v1 = vld [vmem:[#allocation5] sm:$0xff]   ;;  %v78_v2 = vld [vmem:[#allocation2] sm:$0xff]  ;;  %v82_v34 = vlaneseq }
  0x4e   :  { %397 = vmatprep.subr.bf16.mxu0 %v633_v0  ;;  %399 = vmatprep.mubr.msk.bf16.mxu0 %vm634_vm0, %v633_v0  ;;  %v79_v3 = vpack.c.bf16 %v78_v2, %v78_v2  ;;  %vm92_vm1 = vcmask 130048   ;;  %v497_v4 = vld [vmem:[#allocation7] sm:$0xff]   ;;  %v498_v5 = vld [vmem:[#allocation7 + $0x8] sm:$0xff]   ;;  %v499_v6 = vld [vmem:[#allocation7 + $0x10] sm:$0xff]   ;;  %v635_v15 = vmov 0.0|0.0   ;;  %vm338_vm2 = vcmask 64512  }
  0x4f   :  { %403 = vmatprep.subr.bf16.mxu1 %v633_v0  ;;  %419 = vmatprep.mubr.msk.bf16.mxu1 %vm634_vm0, %v633_v0  ;;  %v500_v7 = vld [vmem:[#allocation7 + $0x18] sm:$0xff]   ;;  %v501_v8 = vld [vmem:[#allocation7 + $0x20] sm:$0xff]   ;;  %v502_v9 = vld [vmem:[#allocation7 + $0x28] sm:$0xff]   ;;  %v83_v35 = vshrl.u32 %v82_v34, 7 }
  0x50   :  { %398 = vmatpush3.bf16.msra.mxu0 %v496_v1  ;;  %404 = vmatpush3.bf16.msra.mxu1 %v497_v4  ;;  %v503_v10 = vld [vmem:[#allocation7 + $0x30] sm:$0xff]   ;;  %v504_v11 = vld [vmem:[#allocation7 + $0x38] sm:$0xff]   ;;  %v247_v12 = vld [vmem:[#allocation8] sm:$0xff] }
  0x51   :  { %405 = vmatprep.subr.bf16.mxu1 %v633_v0  ;;  %v248_v13 = vld [vmem:[#allocation8 + $0x8] sm:$0xff]  ;;  %v249_v14 = vld [vmem:[#allocation8 + $0x10] sm:$0xff]  ;;  %458 = vmatprep.subr.bf16.mxu0 %v635_v15  ;;  %v250_v17 = vld [vmem:[#allocation8 + $0x18] sm:$0xff]  ;;  %v84_v36 = vsub.s32 0, %v83_v35  ;;  %v156_v49 = vsub.s32 1, %v83_v35  ;;  %v335_v57 = vsub.s32 2, %v83_v35 }
  0x52   :  { %v459_v16 = vpack.c.bf16 %v248_v13, %v247_v12  ;;  %v462_v18 = vpack.c.bf16 %v250_v17, %v249_v14  ;;  %v251_v19 = vld [vmem:[#allocation8 + $0x20] sm:$0xff]  ;;  %v252_v20 = vld [vmem:[#allocation8 + $0x28] sm:$0xff]  ;;  %v253_v22 = vld [vmem:[#allocation8 + $0x30] sm:$0xff] }
  0x53   :  { %400 = vmatmul.mubr.msk.bf16.vlgmr.msra.gmra.mrb[0].mxu0 %vm92_vm1, %v79_v3  ;;  %v465_v21 = vpack.c.bf16 %v252_v20, %v251_v19  ;;  %v254_v23 = vld [vmem:[#allocation8 + $0x38] sm:$0xff]  ;;  %v255_v25 = vld [vmem:[#allocation8 + $0x40] sm:$0xff]  ;;  %v256_v26 = vld [vmem:[#allocation8 + $0x48] sm:$0xff] }
  0x54   :  { %455 = vmatprep.mubr.msk.f32.mxu0 %vm634_vm0, %v633_v0  ;;  %406 = vmatpush3.bf16.msra.mxu1 %v498_v5  ;;  %v468_v24 = vpack.c.bf16 %v254_v23, %v253_v22  ;;  %v471_v27 = vpack.c.bf16 %v256_v26, %v255_v25  ;;  %v257_v28 = vld [vmem:[#allocation8 + $0x50] sm:$0xff]  ;;  %v258_v29 = vld [vmem:[#allocation8 + $0x58] sm:$0xff]  ;;  %v259_v31 = vld [vmem:[#allocation8 + $0x60] sm:$0xff] }
  0x55   :  { %407 = vmatprep.subr.bf16.mxu1 %v633_v0  ;;  %460 = vmatpush3.bf16.msra.mxu0 %v459_v16  ;;  %v474_v30 = vpack.c.bf16 %v258_v29, %v257_v28  ;;  %v260_v32 = vld [vmem:[#allocation8 + $0x68] sm:$0xff]  ;;  %v261_v46 = vld [vmem:[#allocation8 + $0x70] sm:$0xff]  ;;  %v262_v47 = vld [vmem:[#allocation8 + $0x78] sm:$0xff] }
  0x56   :  { %461 = vmatprep.subr.bf16.mxu0 %v635_v15  ;;  %v477_v33 = vpack.c.bf16 %v260_v32, %v259_v31  ;;  %v77_v37 = vld [vmem:[%s753_s4] sm:$0x7]  ;;  %v480_v48 = vpack.c.bf16 %v262_v47, %v261_v46 }
  0x57   :  { %v85_v38 = vrot.slane %v77_v37, %v84_v36  ;;  %v157_v50 = vrot.slane %v77_v37, %v156_v49  ;;  %v336_v58 = vrot.slane %v77_v37, %v335_v57 }
  0x58   :  { %408 = vmatpush3.bf16.msra.mxu1 %v499_v6 }
  0x59   :  { %409 = vmatprep.subr.bf16.mxu1 %v633_v0  ;;  %463 = vmatpush3.bf16.msra.mxu0 %v462_v18 }
  0x5a   :  { %464 = vmatprep.subr.bf16.mxu0 %v635_v15 }
  0x5c   :  { %410 = vmatpush3.bf16.msra.mxu1 %v500_v7 }
  0x5d   :  { %411 = vmatprep.subr.bf16.mxu1 %v633_v0  ;;  %466 = vmatpush3.bf16.msra.mxu0 %v465_v21 }
  0x5e   :  { %467 = vmatprep.subr.bf16.mxu0 %v635_v15 }
  0x60   :  { %412 = vmatpush3.bf16.msra.mxu1 %v501_v8 }
  0x61   :  { %413 = vmatprep.subr.bf16.mxu1 %v633_v0  ;;  %469 = vmatpush3.bf16.msra.mxu0 %v468_v24 }
  0x62   :  { %470 = vmatprep.subr.bf16.mxu0 %v635_v15 }
  0x64   :  { %414 = vmatpush3.bf16.msra.mxu1 %v502_v9 }
  0x65   :  { %415 = vmatprep.subr.bf16.mxu1 %v633_v0  ;;  %472 = vmatpush3.bf16.msra.mxu0 %v471_v27 }
  0x66   :  { %473 = vmatprep.subr.bf16.mxu0 %v635_v15 }
  0x68   :  { %416 = vmatpush3.bf16.msra.mxu1 %v503_v10 }
  0x69   :  { %417 = vmatprep.subr.bf16.mxu1 %v633_v0  ;;  %475 = vmatpush3.bf16.msra.mxu0 %v474_v30 }
  0x6a   :  { %476 = vmatprep.subr.bf16.mxu0 %v635_v15 }
  0x6c   :  { %418 = vmatpush3.bf16.msra.mxu1 %v504_v11 }
  0x6d   :  { %478 = vmatpush3.bf16.msra.mxu0 %v477_v33 }
  0x6e   :  { %479 = vmatprep.subr.bf16.mxu0 %v635_v15 }
  0x71   :  { %481 = vmatpush3.bf16.msra.mxu0 %v480_v48 }
 0x126   :  { %v130_v39 = vpop.f32.mrb[0].mxu0 }
 0x127   :  { %v131_v40 = vadd.f32 %v130_v39, %v85_v38  ;;  %v401_v41 = vpop.f32.mrb[1].mxu0 }
 0x128   :  { %v133_v42 = vpop.f32.mrb[2].mxu0 }
 0x129   :  { %v136_v43 = vmax.f32 %v131_v40, 0.0  ;;  %v402_v44 = vpop.f32.mrb[3].mxu0 }
 0x12b   :  { %v137_v45 = vpack.c.bf16 %v136_v43, %v136_v43 }
 0x12d   :  { %420 = vmatmul.mubr.bf16.vlgmr.msra.gmra.mrb[0].mxu1 %v137_v45 }
 0x200   :  { %v240_v51 = vpop.f32.mrb[0].mxu1 }
 0x201   :  { %v241_v52 = vadd.f32 %v240_v51, %v157_v50  ;;  %v421_v53 = vpop.f32.mrb[1].mxu1 }
 0x202   :  { %v243_v54 = vpop.f32.mrb[2].mxu1 }
 0x203   :  { %v246_v55 = vmax.f32 %v241_v52, 0.0  ;;  %v422_v56 = vpop.f32.mrb[3].mxu1 }
 0x205   :  { %456 = vmatmul.mubr.f32.vlgmr.msra.gmra.mrb[4].mxu0 %v246_v55 }
 0x2d8   :  { %v329_v59 = vpop.f32.mrb[4].mxu0 }
 0x2d9   :  { %v337_v60 = vadd.f32 %v336_v58, %v329_v59  ;;  %v457_v61 = vpop.f32.mrb[5].mxu0 }
 0x2db   :  { %339 = vst.msk [vmem:[#allocation10] sm:$0xff] %vm338_vm2, %v337_v60 }
 0x2dc   :  { %344 = vsyncadd [#allocation4], 96  ;;  %s636_s4 = smov [#allocation10]  }
 0x2dd   :  { %s345_s22 = sshll.u32 %s636_s4, 4  ;;  %s346_s22 = int_to_ptr.vmem [resolvable:$true] %s345_s22 }
 0x2de   :  { %s593_s23 = scalar_lea.vmem %s346_s22, 32  ;;  %s597_s24 = scalar_lea.vmem %s346_s22, 128 }
 0x2df   :  { %p594_p4 = scmp.ne.s32.totalorder %s346_s22, %s593_s23  ;;  %p598_p5 = scmp.lt.s32.totalorder %s346_s22, %s346_s22 }
 0x2e0   :  { %p599_p6 = scmp.lt.s32.totalorder %s597_s24, %s593_s23 }
 0x2e2   :  { %p600_p7 = por %p599_p6, %p598_p5 }
 0x2e4   :  { %p601_p8 = pnand %p600_p7, %p594_p4 }
 0x2e6   :  { %604 = shalt.err (!%p601_p8)
}
 0x2e7   :  { %s605_s27 = scalar_lea.hbm %s754_s5, 32 }
 0x2e8   :  { %p606_p9 = scmp.ne.s32.totalorder %s754_s5, %s605_s27  ;;  %p609_p10 = scmp.lt.u32.totalorder %s605_s27, %s754_s5 }
 0x2ea   :  { %p611_p11 = pnand %p609_p10, %p606_p9 }
 0x2ec   :  { %614 = shalt.err (!%p611_p11)
}
 0x2ed   :  { %351 = dma.vmem_to_hbm [thread:$0]  %s346_s22, 32, %s754_s5, [#allocation4], %s627_s17, %s627_s17, %s628_s18  }
 0x2ee   :  { %621 = dma.done.wait [#allocation4], 128  }
 0x2ef   :  { %622 = vsyncadd [#allocation4], 4294967168 }
 0x2f0   :  { %355 = vsyncpa [#allocation3], 1 }
 0x2f1   :  { %356 = vsyncpa [#allocation6], 1 }
 0x2f2   :  { %357 = vsyncpa [#allocation9], 1 }
 0x2f3   :  { %358 = vsyncpa [#allocation4], 1 }

</bundles_post_ra>
